<compile_context>
chip_gen: v7x
topology: tpu7x:2x2x1
jax: 0.10.0
libtpu: 0.0.40
codegen_flags: <defaults>
</compile_context>

<pallas_src>
import functools

import jax
import jax.numpy as jnp
from jax.experimental import pallas as pl
from jax.experimental.pallas import tpu as pltpu


def _mlp_kernel(n_layers, x_ref, *refs):
    """Fused MLP over one batch tile.

    x_ref : [tile_b, obs_width]   natural (torch) layout
    refs  = (w1, b1, w2, b2, ..., wN, bN, o_ref)
      w_i : [out_i, in_i]         PyTorch nn.Linear layout
      b_i : [out_i, 1]
    o_ref : [out_space, tile_b]   lane-dense (batch on lanes)
    """
    o_ref = refs[-1]
    p = refs[:-1]

    x = x_ref[...]  # [tile_b, obs_width], f32
    h = None
    for layer in range(n_layers):
        w = p[2 * layer][...]          # [out, in]
        b = p[2 * layer + 1][...]      # [out, 1] -> broadcasts over lanes
        if layer == 0:
            # h = W1 @ x^T : contract the feature axis of both operands.
            # Produces the lane-dense [out1, tile_b] layout with no explicit
            # transpose (neither in the wrapper nor in the kernel).
            h = jax.lax.dot_general(
                w, x,
                dimension_numbers=(((1,), (1,)), ((), ())),
                preferred_element_type=jnp.float32,
            ) + b
        else:
            # [out, in] @ [in, tile_b] -> [out, tile_b]
            h = jnp.dot(w, h, preferred_element_type=jnp.float32) + b
        if layer != n_layers - 1:
            h = jnp.maximum(h, 0.0)    # ReLU between hidden layers only
    o_ref[...] = h.astype(o_ref.dtype)


def _choose_tile_b(batch, max_tile=1024):
    """Pick a lane-dense batch tile.

    * batch <= 256: one full-batch tile (block == full array dim is legal for
      any size, so no (8,128) divisibility concern, no masked lanes).
    * otherwise: a multiple of 128, capped at `max_tile`, chosen so the grid
      has >= 2 steps (lets "parallel" semantics use both v7x TensorCores).
    """
    if batch <= 256:
        return batch
    tile = min(max_tile, batch // 2)
    tile = max(128, (tile // 128) * 128)
    return tile


def pensnet_forward(observation, params, *, tile_b=None, max_tile=1024):
    """Fused MLP forward matching PensNet.forward.

    observation : [B, obs_width] float32
    params      : list of (W [out, in], b [out]) per Linear layer (torch layout)
    Returns     : [B, out_space], with the last axis squeezed iff out_space==1
                  (torch .squeeze(dim=-1) semantics).
    """
    B, obs_width = observation.shape
    n_layers = len(params)
    out_space = params[-1][0].shape[0]

    if tile_b is None:
        tile_b = _choose_tile_b(B, max_tile)

    flat_args = []
    # Observation streams in natural layout; only the batch axis is tiled.
    in_specs = [pl.BlockSpec((tile_b, obs_width), lambda i: (i, 0))]
    for (w, b) in params:
        flat_args.append(w)                       # [out, in], resident in VMEM
        in_specs.append(pl.BlockSpec(w.shape, lambda i: (0, 0)))
        flat_args.append(b.reshape(-1, 1))        # [out, 1], broadcasts over lanes
        in_specs.append(pl.BlockSpec((b.shape[0], 1), lambda i: (0, 0)))

    grid = (pl.cdiv(B, tile_b),)
    out_t = pl.pallas_call(
        functools.partial(_mlp_kernel, n_layers),
        out_shape=jax.ShapeDtypeStruct((out_space, B), observation.dtype),
        grid_spec=pltpu.PrefetchScalarGridSpec(
            num_scalar_prefetch=0,
            grid=grid,
            in_specs=in_specs,
            out_specs=pl.BlockSpec((out_space, tile_b), lambda i: (0, i)),
        ),
        compiler_params=pltpu.CompilerParams(
            dimension_semantics=("parallel",),
        ),
    )(observation, *flat_args)

    # torch .squeeze(dim=-1): only drops the axis if it has size 1.
    if out_space == 1:
        return out_t[0]      # [B]
    # Tiny [out_space, B] -> [B, out_space] transpose (output is the smallest
    # tensor in the problem; keeping the kernel's store lane-dense is worth it).
    return out_t.T


def init_pensnet_params(key, obs_width, out_space, nn_hid):
    """Deterministic init matching PensNet.__init__ layer shapes (torch layout)."""
    input_list = [obs_width] + list(nn_hid)
    output_list = list(nn_hid) + [out_space]
    params = []
    for fan_in, fan_out in zip(input_list, output_list):
        key, kw, kb = jax.random.split(key, 3)
        bound = 1.0 / float(fan_in) ** 0.5
        w = jax.random.uniform(kw, (fan_out, fan_in), jnp.float32, -bound, bound)
        b = jax.random.uniform(kb, (fan_out,), jnp.float32, -bound, bound)
        params.append((w, b))
    return params


def pensnet_reference(observation, params):
    """Pure-JAX reference (torch semantics: h @ W.T + b, ReLU, squeeze(-1))."""
    h = observation
    n = len(params)
    for i, (w, b) in enumerate(params):
        h = h @ w.T + b
        if i != n - 1:
            h = jnp.maximum(h, 0.0)
    if params[-1][0].shape[0] == 1:
        h = h[..., 0]
    return h


# TODO(synk): PensNet.sample_policy (softmax + .cpu()) is a separate exported
# method, not part of forward(); it is intentionally not fused here.


if __name__ == "__main__":
    key = jax.random.PRNGKey(0)
    obs_width = 16
    nn_hid = [32, 32]

    # Check 1: batch large enough for a 2-step grid (megacore-friendly on v7x),
    # out_space > 1 so squeeze(-1) is a no-op.
    batch1, out_space1 = 512, 4
    key, kx1, kp1 = jax.random.split(key, 3)
    obs1 = jax.random.normal(kx1, (batch1, obs_width), jnp.float32)
    params1 = init_pensnet_params(kp1, obs_width, out_space1, nn_hid)
    out1 = jax.block_until_ready(pensnet_forward(obs1, params1))
    ref1 = pensnet_reference(obs1, params1)
    assert out1.shape == ref1.shape, (out1.shape, ref1.shape)
    assert jnp.allclose(out1, ref1, atol=1e-5, rtol=1e-5), "mismatch vs reference (check 1)"

    # Check 2: ragged batch (not a multiple of the 128 tile) + out_space == 1,
    # exercising output masking of the last block and the squeeze(-1) path.
    batch2, out_space2 = 300, 1
    key, kx2, kp2 = jax.random.split(key, 3)
    obs2 = jax.random.normal(kx2, (batch2, obs_width), jnp.float32)
    params2 = init_pensnet_params(kp2, obs_width, out_space2, nn_hid)
    out2 = jax.block_until_ready(pensnet_forward(obs2, params2))
    ref2 = pensnet_reference(obs2, params2)
    assert out2.shape == ref2.shape, (out2.shape, ref2.shape)
    assert jnp.allclose(out2, ref2, atol=1e-5, rtol=1e-5), "mismatch vs reference (check 2)"

    print("KERNEL_OK")
</pallas_src>

<mosaic_0001>
module attributes {stable_mosaic.version = 11 : i64} {
  func.func @_mlp_kernel(%arg0: i32, %arg1: memref<256x16xf32, #tpu.memory_space<vmem>>, %arg2: memref<32x16xf32, #tpu.memory_space<vmem>>, %arg3: memref<32x1xf32, #tpu.memory_space<vmem>>, %arg4: memref<32x32xf32, #tpu.memory_space<vmem>>, %arg5: memref<32x1xf32, #tpu.memory_space<vmem>>, %arg6: memref<4x32xf32, #tpu.memory_space<vmem>>, %arg7: memref<4x1xf32, #tpu.memory_space<vmem>>, %arg8: memref<4x256xf32, #tpu.memory_space<vmem>>) attributes {dimension_semantics = [#tpu.dimension_semantics<parallel>], iteration_bounds = array<i64: 2>, scalar_prefetch = 0 : i64, scratch_operands = 0 : i64, tpu.core_type = #tpu.core_type<tc>, window_params = [{transform_indices = @transform_0, window_bounds = array<i64: 256, 16>}, {pipeline_mode = #tpu.pipeline_mode<synchronous>, transform_indices = @transform_1, window_bounds = array<i64: 32, 16>}, {pipeline_mode = #tpu.pipeline_mode<synchronous>, transform_indices = @transform_2, window_bounds = array<i64: 32, 1>}, {pipeline_mode = #tpu.pipeline_mode<synchronous>, transform_indices = @transform_3, window_bounds = array<i64: 32, 32>}, {pipeline_mode = #tpu.pipeline_mode<synchronous>, transform_indices = @transform_4, window_bounds = array<i64: 32, 1>}, {pipeline_mode = #tpu.pipeline_mode<synchronous>, transform_indices = @transform_5, window_bounds = array<i64: 4, 32>}, {pipeline_mode = #tpu.pipeline_mode<synchronous>, transform_indices = @transform_6, window_bounds = array<i64: 4, 1>}, {transform_indices = @transform_7, window_bounds = array<i64: 4, 256>}]} {
    %c0 = arith.constant 0 : index
    %c0_0 = arith.constant 0 : index
    %0 = vector.load %arg1[%c0, %c0_0] : memref<256x16xf32, #tpu.memory_space<vmem>>, vector<256x16xf32>
    %c0_1 = arith.constant 0 : index
    %c0_2 = arith.constant 0 : index
    %1 = vector.load %arg2[%c0_1, %c0_2] : memref<32x16xf32, #tpu.memory_space<vmem>>, vector<32x16xf32>
    %c0_3 = arith.constant 0 : index
    %c0_4 = arith.constant 0 : index
    %2 = vector.load %arg3[%c0_3, %c0_4] : memref<32x1xf32, #tpu.memory_space<vmem>>, vector<32x1xf32>
    %cst = arith.constant dense<0.000000e+00> : vector<32x256xf32>
    %3 = tpu.matmul %1, %0, %cst {dimension_numbers = #tpu.dot_dimension_numbers<[1], [1], [0], [0], [0, 0, 1, 0], [], []>} : vector<32x16xf32>, vector<256x16xf32>, vector<32x256xf32> -> vector<32x256xf32>
    %4 = vector.broadcast %2 : vector<32x1xf32> to vector<32x256xf32>
    %5 = arith.addf %3, %4 : vector<32x256xf32>
    %cst_5 = arith.constant 0.000000e+00 : f32
    %6 = vector.broadcast %cst_5 : f32 to vector<32x256xf32>
    %7 = arith.maximumf %5, %6 : vector<32x256xf32>
    %c0_6 = arith.constant 0 : index
    %c0_7 = arith.constant 0 : index
    %8 = vector.load %arg4[%c0_6, %c0_7] : memref<32x32xf32, #tpu.memory_space<vmem>>, vector<32x32xf32>
    %c0_8 = arith.constant 0 : index
    %c0_9 = arith.constant 0 : index
    %9 = vector.load %arg5[%c0_8, %c0_9] : memref<32x1xf32, #tpu.memory_space<vmem>>, vector<32x1xf32>
    %cst_10 = arith.constant dense<0.000000e+00> : vector<32x256xf32>
    %10 = tpu.matmul %8, %7, %cst_10 {dimension_numbers = #tpu.dot_dimension_numbers<[1], [0], [0], [1], [0, 0, 1, 1], [], []>} : vector<32x32xf32>, vector<32x256xf32>, vector<32x256xf32> -> vector<32x256xf32>
    %11 = vector.broadcast %9 : vector<32x1xf32> to vector<32x256xf32>
    %12 = arith.addf %10, %11 : vector<32x256xf32>
    %cst_11 = arith.constant 0.000000e+00 : f32
    %13 = vector.broadcast %cst_11 : f32 to vector<32x256xf32>
    %14 = arith.maximumf %12, %13 : vector<32x256xf32>
    %c0_12 = arith.constant 0 : index
    %c0_13 = arith.constant 0 : index
    %15 = vector.load %arg6[%c0_12, %c0_13] : memref<4x32xf32, #tpu.memory_space<vmem>>, vector<4x32xf32>
    %c0_14 = arith.constant 0 : index
    %c0_15 = arith.constant 0 : index
    %16 = vector.load %arg7[%c0_14, %c0_15] : memref<4x1xf32, #tpu.memory_space<vmem>>, vector<4x1xf32>
    %cst_16 = arith.constant dense<0.000000e+00> : vector<4x256xf32>
    %17 = tpu.matmul %15, %14, %cst_16 {dimension_numbers = #tpu.dot_dimension_numbers<[1], [0], [0], [1], [0, 0, 1, 1], [], []>} : vector<4x32xf32>, vector<32x256xf32>, vector<4x256xf32> -> vector<4x256xf32>
    %18 = vector.broadcast %16 : vector<4x1xf32> to vector<4x256xf32>
    %19 = arith.addf %17, %18 : vector<4x256xf32>
    %c0_17 = arith.constant 0 : index
    %c0_18 = arith.constant 0 : index
    %20 = vector.load %arg8[%c0_17, %c0_18] : memref<4x256xf32, #tpu.memory_space<vmem>>, vector<4x256xf32>
    tpu.vector_store %arg8[%c0_17, %c0_18], %19 {strides = array<i32>} : memref<4x256xf32, #tpu.memory_space<vmem>>, vector<4x256xf32>,
    return
  }
  func.func @transform_0(%arg0: i32) -> (i32, i32) {
    %c0_i32 = arith.constant 0 : i32
    %c0_i32_0 = arith.constant 0 : i32
    return %arg0, %c0_i32 : i32, i32
  }
  func.func @transform_1(%arg0: i32) -> (i32, i32) {
    %c0_i32 = arith.constant 0 : i32
    %c0_i32_0 = arith.constant 0 : i32
    %c0_i32_1 = arith.constant 0 : i32
    return %c0_i32, %c0_i32_0 : i32, i32
  }
  func.func @transform_2(%arg0: i32) -> (i32, i32) {
    %c0_i32 = arith.constant 0 : i32
    %c0_i32_0 = arith.constant 0 : i32
    %c0_i32_1 = arith.constant 0 : i32
    return %c0_i32, %c0_i32_0 : i32, i32
  }
  func.func @transform_3(%arg0: i32) -> (i32, i32) {
    %c0_i32 = arith.constant 0 : i32
    %c0_i32_0 = arith.constant 0 : i32
    %c0_i32_1 = arith.constant 0 : i32
    return %c0_i32, %c0_i32_0 : i32, i32
  }
  func.func @transform_4(%arg0: i32) -> (i32, i32) {
    %c0_i32 = arith.constant 0 : i32
    %c0_i32_0 = arith.constant 0 : i32
    %c0_i32_1 = arith.constant 0 : i32
    return %c0_i32, %c0_i32_0 : i32, i32
  }
  func.func @transform_5(%arg0: i32) -> (i32, i32) {
    %c0_i32 = arith.constant 0 : i32
    %c0_i32_0 = arith.constant 0 : i32
    %c0_i32_1 = arith.constant 0 : i32
    return %c0_i32, %c0_i32_0 : i32, i32
  }
  func.func @transform_6(%arg0: i32) -> (i32, i32) {
    %c0_i32 = arith.constant 0 : i32
    %c0_i32_0 = arith.constant 0 : i32
    %c0_i32_1 = arith.constant 0 : i32
    return %c0_i32, %c0_i32_0 : i32, i32
  }
  func.func @transform_7(%arg0: i32) -> (i32, i32) {
    %c0_i32 = arith.constant 0 : i32
    %c0_i32_0 = arith.constant 0 : i32
    return %c0_i32, %arg0 : i32, i32
  }
}

</mosaic_0001>

<bundles_post_ra>
// kernel: tpu_custom_call.1
= control target key start
LH: loop header
LB: loop body
LE: loop exit
PB: predicated region body
PF: predicated region fallthrough
CT: control target
= control target key end

     0   :  { %12 = vsyncpa [#allocation3], 0  ;;  %s1394_s0 = inlined_call_operand.vmem [shape: f32[512,16], index: 0, kind: input, shape index: {}]   ;;  %s1395_s1 = inlined_call_operand.vmem [shape: f32[32,16], index: 1, kind: input, shape index: {}]   ;;  %s1396_s2 = inlined_call_operand.vmem [shape: f32[32,1], index: 2, kind: input, shape index: {}]   ;;  %s1397_s3 = inlined_call_operand.vmem [shape: f32[32,32], index: 3, kind: input, shape index: {}]   ;;  %s1398_s4 = inlined_call_operand.vmem [shape: f32[32,1], index: 4, kind: input, shape index: {}]   ;;  %s1399_s5 = inlined_call_operand.vmem [shape: f32[4,32], index: 5, kind: input, shape index: {}]   ;;  %s1400_s6 = inlined_call_operand.vmem [shape: f32[4,1], index: 6, kind: input, shape index: {}]   ;;  %s1401_s7 = inlined_call_operand.hbm [shape: f32[4,512], index: 7, kind: output, shape index: {}]  }
   0x1   :  { %14 = vsyncpa [#allocation3 + $0x1], 0  ;;  %s1152_s24 = smov 0   ;;  %s1154_s25 = smov 0  }
   0x2   :  { %s1156_s26 = smov 0   ;;  %s1158_s27 = smov 0  }
   0x3 LB: > { %s1173_s28 = sadd.s32 4294967295, %s1107_s27   ;;  %s844_s29 = sadd.s32 4294967294, %s1107_s27   ;;  %s1107_s27 = sphi %s1158_s27, %s1409_s27   ;;  %s1103_s26 = sphi %s1156_s26, %s1408_s26   ;;  %s1099_s25 = sphi %s1154_s25, %s1407_s25   ;;  %s1095_s24 = sphi %s1152_s24, %s1406_s24  }
   0x4   : > { %s1177_s30 = sadd.s32 1, %s1107_s27   ;;  %s179_s8 = sadd.s32 1, %s1103_s26 }
   0x5   : > { %s176_s9 = ssub.s32 %s1107_s27, %s1177_s30  ;;  %p189_p0 = scmp.ne.s32.totalorder %s1103_s26, %s1099_s25 }
   0x6   : > { %p177_p1 = scmp.eq.s32.totalorder %s176_s9, 0  ;;  %p190_p2 = scmp.eq.s32.totalorder %s1173_s28, 1 }
   0x7   : > { %p195_p3 = scmp.ne.s32.totalorder %s1099_s25, %s1095_s24  ;;  %p196_p4 = scmp.eq.s32.totalorder %s844_s29, 1 }
   0x8   : > { %s1188_s10 = scalar_select %p177_p1, %s1103_s26, %s179_s8  }
   0x9   : > { %p1190_p5 = por %p190_p2, %p189_p0  ;;  %p1194_p6 = por %p196_p4, %p195_p3 }
   0xa   : > { %p847_p7 = scmp.ge.s32.totalorder %s1107_s27, 1  ;;  %p241_p8 = scmp.lt.s32.totalorder %s1107_s27, 3 }
   0xc   : > { %p242_p9 = pnand %p847_p7, %p241_p8 }
   0xd   : > { %s849_s13 = sshll.u32 (!%p242_p9), %s1173_s28, 5  ;;  %vm340_vm0 = vcmask (!%p242_p9), 130048   ;;  %v1204_v0 = vld [vmem:[%s1395_s1] sm:$0xff] (!%p242_p9)  ;;  %v1109_v1 = vmov (!%p242_p9), 0   ;;  %v318_v3 = vld [vmem:[%s1396_s2 + $0x10] sm:$0xff] (!%p242_p9)  ;;  %v317_v4 = vld [vmem:[%s1396_s2 + $0x8] sm:$0xff] (!%p242_p9) }
   0xe   : > { %245 = sbr.rel (%p242_p9) target bundleno = 792 (0x318), region = 48  ;;  %p274_p10 = scmp.lt.s32.totalorder (!%p242_p9), %s849_s13, 63  ;;  %930 = vmatprep.mubr.msk.f32.mxu0 (!%p242_p9), %vm340_vm0, %v1204_v0  ;;  %1043 = vset.pattern.permute.xlu0 (!%p242_p9), %v1109_v1  ;;  %v316_v2 = vld [vmem:[%s1396_s2] sm:$0xff] (!%p242_p9)  ;;  %v319_v5 = vld [vmem:[%s1396_s2 + $0x18] sm:$0xff] (!%p242_p9)  ;;  %vm1227_vm1 = vmpackc.low (!%p242_p9), %vm340_vm0, %vm340_vm0  ;;  %v1110_v63 = vmov (!%p242_p9), 0.0   ;;  %vm574_vm2 = vcmask (!%p242_p9), 261120  }
   0xf   : > { %322 = vperm.xlu0 (!%p242_p9), %1043, %v316_v2   ;;  %1044 = vset.pattern.permute.xlu1 (!%p242_p9), %v1109_v1  ;;  %v550_v7 = vld [vmem:[%s1398_s4] sm:$0xff] (!%p242_p9)  ;;  %v551_v8 = vld [vmem:[%s1398_s4 + $0x8] sm:$0xff] (!%p242_p9)  ;;  %v552_v18 = vld [vmem:[%s1398_s4 + $0x10] sm:$0xff] (!%p242_p9)  ;;  %s270_s9 = sand.u32 (!%p242_p9), 1, %s1099_s25  }
  0x10   : > { %332 = vperm.xlu1 (!%p242_p9), %1044, %v318_v3   ;;  %v553_v21 = vld [vmem:[%s1398_s4 + $0x18] sm:$0xff] (!%p242_p9)  ;;  %v685_v25 = vld [vmem:[%s1400_s6] sm:$0xf] (!%p242_p9)  ;;  %v313_v60 = vld [vmem:[%s1395_s1 + $0x8] sm:$0xff] (!%p242_p9)  ;;  %651 = vmatprep.mubr.f32.mxu1 (!%p242_p9), %v1110_v63  ;;  %s848_s15 = sshll.u32 (!%p242_p9), %s270_s9, 3  ;;  %s771_s20 = scalar_lea.sflag (!%p242_p9), [#allocation3], %s270_s9 }
  0x11   : > { %v314_v61 = vld [vmem:[%s1395_s1 + $0x10] sm:$0xff] (!%p242_p9)  ;;  %v315_v62 = vld [vmem:[%s1395_s1 + $0x18] sm:$0xff] (!%p242_p9) }
  0x13   : > { %327 = vperm.xlu0 (!%p242_p9), %1043, %v317_v4  }
  0x14   : > { %337 = vperm.xlu1 (!%p242_p9), %1044, %v319_v5  }
  0x15   : > { %s1411_s13 = smov (!%p274_p10, %s849_s13), 63 }
  0x16   : > { %s850_s29 = sshll.u32 %s1411_s13, 3  ;;  %s272_s13 = scalar_lea.vmem [#allocation2], %s848_s15 }
  0x17   : > { %s1223_s14 = scalar_lea.vmem %s1394_s0, %s850_s29  ;;  %556 = vperm.xlu0 %1043, %v550_v7   ;;  %s785_s16 = sshll.u32 %s272_s13, 4  ;;  %s1354_s16 = int_to_ptr.vmem [resolvable:$true] %s785_s16 }
  0x18   : > { %v296_v9 = vld [vmem:[%s1223_s14 + $0x80] sm:$0xff]  ;;  %v297_v10 = vld [vmem:[%s1223_s14 + $0x88] sm:$0xff]  ;;  %v298_v14 = vld [vmem:[%s1223_s14 + $0x90] sm:$0xff]  ;;  %561 = vperm.xlu1 %1044, %v551_v8   ;;  %s1045_s21 = scalar_lea.vmem %s1354_s16, 128 }
  0x19   : > { %v280_v11 = vld [vmem:[%s1223_s14] sm:$0xff]  ;;  %v938_v12 = vpack.c.bf16 %v297_v10, %v296_v9  ;;  %v281_v13 = vld [vmem:[%s1223_s14 + $0x8] sm:$0xff]  ;;  %v299_v15 = vld [vmem:[%s1223_s14 + $0x98] sm:$0xff]  ;;  %p1046_p11 = scmp.ne.s32.totalorder %s1354_s16, %s1045_s21 }
  0x1a   : > { %v941_v16 = vpack.c.bf16 %v281_v13, %v280_v11  ;;  %v944_v17 = vpack.c.bf16 %v299_v15, %v298_v14  ;;  %v282_v19 = vld [vmem:[%s1223_s14 + $0x10] sm:$0xff]  ;;  %v283_v20 = vld [vmem:[%s1223_s14 + $0x18] sm:$0xff]  ;;  %v300_v22 = vld [vmem:[%s1223_s14 + $0xa0] sm:$0xff] }
  0x1b   : > { %940 = vmatprep.subr.msk.bf16.mxu0 %vm1227_vm1, %v938_v12  ;;  %v301_v23 = vld [vmem:[%s1223_s14 + $0xa8] sm:$0xff]  ;;  %566 = vperm.xlu0 %1043, %v552_v18   ;;  %v947_v24 = vpack.c.bf16 %v283_v20, %v282_v19  ;;  %v284_v27 = vld [vmem:[%s1223_s14 + $0x20] sm:$0xff]  ;;  %v302_v29 = vld [vmem:[%s1223_s14 + $0xb0] sm:$0xff]  ;;  %p1047_p12 = pnand %p1046_p11, %p1190_p5 }
  0x1c   : > { %943 = vmatpush3.bf16.xpose.msk.msra.mxu0 %vm1227_vm1, %v941_v16  ;;  %571 = vperm.xlu1 %1044, %v553_v21   ;;  %v950_v26 = vpack.c.bf16 %v301_v23, %v300_v22  ;;  %v285_v28 = vld [vmem:[%s1223_s14 + $0x28] sm:$0xff]  ;;  %v303_v30 = vld [vmem:[%s1223_s14 + $0xb8] sm:$0xff]  ;;  %v286_v33 = vld [vmem:[%s1223_s14 + $0x30] sm:$0xff] }
  0x1d   : > { %946 = vmatprep.subr.msk.bf16.mxu0 %vm1227_vm1, %v944_v17  ;;  %v953_v31 = vpack.c.bf16 %v285_v28, %v284_v27  ;;  %v956_v32 = vpack.c.bf16 %v303_v30, %v302_v29  ;;  %v287_v34 = vld [vmem:[%s1223_s14 + $0x38] sm:$0xff]  ;;  %v304_v35 = vld [vmem:[%s1223_s14 + $0xc0] sm:$0xff]  ;;  %v305_v36 = vld [vmem:[%s1223_s14 + $0xc8] sm:$0xff]  ;;  %p1048_p13 = pneg %p1047_p12 }
  0x1e   : > { %v959_v37 = vpack.c.bf16 %v287_v34, %v286_v33  ;;  %v962_v38 = vpack.c.bf16 %v305_v36, %v304_v35  ;;  %v288_v39 = vld [vmem:[%s1223_s14 + $0x40] sm:$0xff]  ;;  %v289_v40 = vld [vmem:[%s1223_s14 + $0x48] sm:$0xff]  ;;  %v306_v41 = vld [vmem:[%s1223_s14 + $0xd0] sm:$0xff] }
  0x1f   : > { %688 = vperm.xlu0 %1043, %v685_v25   ;;  %v307_v42 = vld [vmem:[%s1223_s14 + $0xd8] sm:$0xff]  ;;  %v965_v43 = vpack.c.bf16 %v289_v40, %v288_v39  ;;  %v290_v45 = vld [vmem:[%s1223_s14 + $0x50] sm:$0xff]  ;;  %v308_v47 = vld [vmem:[%s1223_s14 + $0xe0] sm:$0xff] }
  0x20   : > { %v968_v44 = vpack.c.bf16 %v307_v42, %v306_v41  ;;  %v291_v46 = vld [vmem:[%s1223_s14 + $0x58] sm:$0xff]  ;;  %v309_v48 = vld [vmem:[%s1223_s14 + $0xe8] sm:$0xff]  ;;  %v292_v51 = vld [vmem:[%s1223_s14 + $0x60] sm:$0xff] }
  0x21   : > { %v971_v49 = vpack.c.bf16 %v291_v46, %v290_v45  ;;  %v974_v50 = vpack.c.bf16 %v309_v48, %v308_v47  ;;  %v293_v52 = vld [vmem:[%s1223_s14 + $0x68] sm:$0xff]  ;;  %v310_v53 = vld [vmem:[%s1223_s14 + $0xf0] sm:$0xff]  ;;  %v311_v54 = vld [vmem:[%s1223_s14 + $0xf8] sm:$0xff] }
  0x22   : > { %v977_v55 = vpack.c.bf16 %v293_v52, %v292_v51  ;;  %v980_v56 = vpack.c.bf16 %v311_v54, %v310_v53  ;;  %v294_v57 = vld [vmem:[%s1223_s14 + $0x70] sm:$0xff]  ;;  %v295_v58 = vld [vmem:[%s1223_s14 + $0x78] sm:$0xff]  ;;  %v547_v33 = vld [vmem:[%s1397_s3 + $0x8] sm:$0xff]  ;;  %s897_s14 = sshll.u32 %s1173_s28, 7  ;;  %s1111_s28 = smov [#allocation2]  }
  0x23   : > { %v983_v59 = vpack.c.bf16 %v295_v58, %v294_v57  ;;  %v548_v34 = vld [vmem:[%s1397_s3 + $0x10] sm:$0xff]  ;;  %v549_v35 = vld [vmem:[%s1397_s3 + $0x18] sm:$0xff]  ;;  %s1352_s19 = scalar_lea.hbm %s1401_s7, %s897_s14  ;;  %s1049_s22 = sshll.u32 %s1111_s28, 4  ;;  %s1050_s22 = int_to_ptr.vmem [resolvable:$false] %s1049_s22 }
  0x24   : > { %949 = vmatpush3.bf16.xpose.msk.msra.mxu0 %vm1227_vm1, %v947_v24  ;;  %s1051_s23 = scalar_lea.vmem %s1050_s22, 256  ;;  %p1052_p0 = scmp.lt.s32.totalorder %s1354_s16, %s1050_s22 }
  0x25   : > { %952 = vmatprep.subr.msk.bf16.mxu0 %vm1227_vm1, %v950_v26  ;;  %p1053_p1 = scmp.lt.s32.totalorder %s1051_s23, %s1045_s21 }
  0x27   : > { %p1054_p2 = por %p1053_p1, %p1052_p0 }
  0x29   : > { %p1055_p3 = pnand %p1054_p2, %p1048_p13 }
  0x2c   : > { %955 = vmatpush3.bf16.xpose.msk.msra.mxu0 %vm1227_vm1, %v953_v31 }
  0x2d   : > { %958 = vmatprep.subr.msk.bf16.mxu0 %vm1227_vm1, %v956_v32  ;;  %v546_v32 = vld [vmem:[%s1397_s3] sm:$0xff] }
  0x34   : > { %961 = vmatpush3.bf16.xpose.msk.msra.mxu0 %vm1227_vm1, %v959_v37 }
  0x35   : > { %964 = vmatprep.subr.msk.bf16.mxu0 %vm1227_vm1, %v962_v38 }
  0x3c   : > { %967 = vmatpush3.bf16.xpose.msk.msra.mxu0 %vm1227_vm1, %v965_v43 }
  0x3d   : > { %970 = vmatprep.subr.msk.bf16.mxu0 %vm1227_vm1, %v968_v44 }
  0x44   : > { %973 = vmatpush3.bf16.xpose.msk.msra.mxu0 %vm1227_vm1, %v971_v49 }
  0x45   : > { %976 = vmatprep.subr.msk.bf16.mxu0 %vm1227_vm1, %v974_v50 }
  0x4c   : > { %979 = vmatpush3.bf16.xpose.msk.msra.mxu0 %vm1227_vm1, %v977_v55 }
  0x4d   : > { %982 = vmatprep.subr.msk.bf16.mxu0 %vm1227_vm1, %v980_v56 }
  0x54   : > { %985 = vmatpush3.bf16.xpose.msk.msra.mxu0 %vm1227_vm1, %v983_v59 }
  0x5b   : > { %931 = vmatmul.mubr.msk.f32.vlgmr.msra.gmra.mrb[0].mxu0 %vm340_vm0, %v1204_v0 }
  0x5c   : > { %932 = vmatprep.mubr.msk.f32.mxu0 %vm340_vm0, %v313_v60 }
  0x5f   : > { %933 = vmatmul.mubr.msk.f32.gmra.mrb[2].mxu0 %vm340_vm0, %v313_v60 }
  0x60   : > { %934 = vmatprep.mubr.msk.f32.mxu0 %vm340_vm0, %v314_v61 }
  0x63   : > { %935 = vmatmul.mubr.msk.f32.gmra.mrb[4].mxu0 %vm340_vm0, %v314_v61 }
  0x64   : > { %936 = vmatprep.mubr.msk.f32.mxu0 %vm340_vm0, %v315_v62 }
  0x67   : > { %937 = vmatmul.mubr.msk.f32.gmra.mrb[6].mxu0 %vm340_vm0, %v315_v62 }
  0x8e   : > { %v323_v0 = vpop.permute.xlu0 %322 }
  0x8f   : > { %v333_v9 = vpop.permute.xlu1 %332 }
  0x92   : > { %v328_v4 = vpop.permute.xlu0 %327 }
  0x93   : > { %v338_v20 = vpop.permute.xlu1 %337 }
  0x96   : > { %v557_v38 = vpop.permute.xlu0 %556 }
  0x97   : > { %v562_v40 = vpop.permute.xlu1 %561 }
  0x9a   : > { %v567_v53 = vpop.permute.xlu0 %566 }
  0x9b   : > { %v572_v56 = vpop.permute.xlu1 %571 }
 0x12e   : > { %v515_v1 = vpop.f32.mrb[0].mxu0 }
 0x12f   : > { %v517_v2 = vpop.f32.mrb[1].mxu0  ;;  %v516_v3 = vadd.f32 %v515_v1, %v323_v0 }
 0x130   : > { %v518_v5 = vadd.f32 %v517_v2, %v323_v0 }
 0x131   : > { %v538_v11 = vmax.f32 %v516_v3, 0.0 }
 0x132   : > { %v521_v6 = vpop.f32.mrb[2].mxu0  ;;  %v539_v13 = vmax.f32 %v518_v5, 0.0  ;;  %v689_v5 = vpop.permute.xlu0 %688 }
 0x133   : > { %v522_v7 = vadd.f32 %v521_v6, %v328_v4  ;;  %v523_v8 = vpop.f32.mrb[3].mxu0 }
 0x134   : > { %v524_v10 = vadd.f32 %v523_v8, %v328_v4  ;;  %v684_v4 = vld [vmem:[%s1399_s5] sm:$0xf] }
 0x135   : > { %v540_v12 = vmax.f32 %v522_v7, 0.0 }
 0x136   : > { %v541_v14 = vmax.f32 %v524_v10, 0.0  ;;  %v527_v15 = vpop.f32.mrb[4].mxu0 }
 0x137   : > { %v529_v16 = vpop.f32.mrb[5].mxu0  ;;  %v988_v17 = vpack.c.bf16 %v540_v12, %v538_v11  ;;  %v528_v19 = vadd.f32 %v527_v15, %v333_v9 }
 0x138   : > { %v986_v18 = vpack.c.bf16 %v541_v14, %v539_v13  ;;  %v530_v21 = vadd.f32 %v529_v16, %v333_v9 }
 0x139   : > { %v542_v26 = vmax.f32 %v528_v19, 0.0 }
 0x13a   : > { %v533_v22 = vpop.f32.mrb[6].mxu0  ;;  %987 = vmatprep.subr.bf16.mxu1 %v986_v18  ;;  %v543_v28 = vmax.f32 %v530_v21, 0.0 }
 0x13b   : > { %v534_v23 = vadd.f32 %v533_v22, %v338_v20  ;;  %v535_v24 = vpop.f32.mrb[7].mxu0  ;;  %989 = vmatpush1.bf16.msra.mxu1 %v988_v17 }
 0x13c   : > { %v536_v25 = vadd.f32 %v535_v24, %v338_v20 }
 0x13d   : > { %v544_v27 = vmax.f32 %v534_v23, 0.0 }
 0x13e   : > { %v545_v29 = vmax.f32 %v536_v25, 0.0 }
 0x13f   : > { %v992_v30 = vpack.c.bf16 %v544_v27, %v542_v26 }
 0x140   : > { %v990_v31 = vpack.c.bf16 %v545_v29, %v543_v28 }
 0x142   : > { %991 = vmatprep.subr.bf16.mxu1 %v990_v31 }
 0x143   : > { %993 = vmatpush1.bf16.msra.mxu1 %v992_v30 }
 0x146   : > { %887 = vmatmul.mubr.msk.f32.vlgmr.msra.gmra.mrb[0].mxu1 %vm574_vm2, %v546_v32 }
 0x147   : > { %657 = vmatprep.mubr.f32.mxu1 %v1110_v63 }
 0x14a   : > { %888 = vmatmul.mubr.msk.f32.gmra.mrb[2].mxu1 %vm574_vm2, %v547_v33 }
 0x14b   : > { %663 = vmatprep.mubr.f32.mxu1 %v1110_v63 }
 0x14e   : > { %889 = vmatmul.mubr.msk.f32.gmra.mrb[4].mxu1 %vm574_vm2, %v548_v34 }
 0x14f   : > { %669 = vmatprep.mubr.f32.mxu1 %v1110_v63 }
 0x152   : > { %890 = vmatmul.mubr.msk.f32.gmra.mrb[6].mxu1 %vm574_vm2, %v549_v35 }
 0x153   : > { %758 = vmatprep.mubr.f32.mxu1 %v1110_v63 }
 0x219   : > { %v653_v36 = vpop.f32.mrb[0].mxu1 }
 0x21a   : > { %v655_v37 = vpop.f32.mrb[1].mxu1  ;;  %v654_v39 = vadd.f32 %v653_v36, %v557_v38 }
 0x21b   : > { %v656_v41 = vadd.f32 %v655_v37, %v557_v38 }
 0x21c   : > { %v676_v46 = vmax.f32 %v654_v39, 0.0 }
 0x21d   : > { %v659_v42 = vpop.f32.mrb[2].mxu1  ;;  %v677_v48 = vmax.f32 %v656_v41, 0.0 }
 0x21e   : > { %v660_v43 = vadd.f32 %v659_v42, %v562_v40  ;;  %v661_v44 = vpop.f32.mrb[3].mxu1 }
 0x21f   : > { %v662_v45 = vadd.f32 %v661_v44, %v562_v40 }
 0x220   : > { %v678_v47 = vmax.f32 %v660_v43, 0.0 }
 0x221   : > { %v679_v49 = vmax.f32 %v662_v45, 0.0  ;;  %v665_v50 = vpop.f32.mrb[4].mxu1 }
 0x222   : > { %v996_v51 = vpack.c.bf16 %v678_v47, %v676_v46  ;;  %v667_v52 = vpop.f32.mrb[5].mxu1  ;;  %v666_v55 = vadd.f32 %v665_v50, %v567_v53 }
 0x223   : > { %v994_v54 = vpack.c.bf16 %v679_v49, %v677_v48  ;;  %v668_v57 = vadd.f32 %v667_v52, %v567_v53 }
 0x224   : > { %v680_v62 = vmax.f32 %v666_v55, 0.0 }
 0x225   : > { %v671_v58 = vpop.f32.mrb[6].mxu1  ;;  %995 = vmatprep.subr.bf16.mxu1 %v994_v54  ;;  %v681_v0 = vmax.f32 %v668_v57, 0.0 }
 0x226   : > { %v672_v59 = vadd.f32 %v671_v58, %v572_v56  ;;  %v673_v60 = vpop.f32.mrb[7].mxu1  ;;  %997 = vmatpush1.bf16.msra.mxu1 %v996_v51 }
 0x227   : > { %v674_v61 = vadd.f32 %v673_v60, %v572_v56 }
 0x228   : > { %v682_v63 = vmax.f32 %v672_v59, 0.0 }
 0x229   : > { %v683_v1 = vmax.f32 %v674_v61, 0.0 }
 0x22a   : > { %v1000_v2 = vpack.c.bf16 %v682_v63, %v680_v62 }
 0x22b   : > { %v998_v3 = vpack.c.bf16 %v683_v1, %v681_v0 }
 0x22d   : > { %999 = vmatprep.subr.bf16.mxu1 %v998_v3 }
 0x22e   : > { %1001 = vmatpush1.bf16.msra.mxu1 %v1000_v2 }
 0x231   : > { %891 = vmatmul.mubr.msk.f32.vlgmr.msra.gmra.mrb[8].mxu1 %vm574_vm2, %v684_v4 }
 0x304   : > { %v760_v6 = vpop.f32.mrb[8].mxu1 }
 0x305   : > { %v761_v7 = vadd.f32 %v760_v6, %v689_v5  ;;  %v762_v8 = vpop.f32.mrb[9].mxu1 }
 0x306   : > { %v763_v9 = vadd.f32 %v762_v8, %v689_v5 }
 0x308   : > { %v767_v10 = vcombine.low %v761_v7, %v763_v9 }
 0x30a   : > { %769 = vst [vmem:[%s272_s13] sm:$0xff] %v767_v10 }
 0x30b   : > { %1058 = shalt.err (!%p1055_p3)
}
 0x30c   : > { %s1059_s29 = scalar_lea.hbm %s1352_s19, 128  ;;  %s1063_s15 = scalar_lea.hbm %s1401_s7, 256 }
 0x30d   : > { %p1060_p4 = scmp.ne.s32.totalorder %s1352_s19, %s1059_s29  ;;  %p1064_p9 = scmp.lt.u32.totalorder %s1352_s19, %s1401_s7 }
 0x30e   : > { %p1065_p10 = scmp.lt.u32.totalorder %s1063_s15, %s1059_s29  ;;  %p1067_p12 = scmp.lt.u32.totalorder %s1059_s29, %s1352_s19 }
 0x30f   : > { %p1061_p7 = pnand %p1060_p4, %p1190_p5 }
 0x310   : > { %p1066_p11 = por %p1065_p10, %p1064_p9 }
 0x311   : > { %p1062_p8 = pneg %p1061_p7 }
 0x312   : > { %p1068_p13 = por %p1067_p12, %p1066_p11 }
 0x314   : > { %p1069_p0 = pnand %p1068_p13, %p1062_p8 }
 0x316   : > { %1072 = shalt.err (!%p1069_p0)
}
 0x317   : > { %1002 = dma.vmem_to_hbm [thread:$0]  (%p1190_p5), %s1354_s16, 128, %s1352_s19, %s771_s20  }
 0x318 PF: > { %p1008_p1 = scmp.ge.s32.totalorder %s1107_s27, 2  ;;  %s797_s17 = sand.u32 1, %s1095_s24  }
 0x319   : > { %s798_s18 = scalar_lea.sflag [#allocation3], %s797_s17 }
 0x31a   : > { %p1005_p2 = pnand %p1008_p1, %p1194_p6 }
 0x31c   : > { %1090 = dma.done.wait (!%p1005_p2), %s798_s18, 128  }
 0x31d   : > { %1092 = vsyncadd (!%p1005_p2), %s798_s18, 4294967168  ;;  %p17_p3 = scmp.ge.s32.totalorder %s1177_s30, 4   ;;  %s1406_s24 = smov %s1099_s25 }
 0x31e   : > { %s1407_s25 = smov %s1103_s26  ;;  %s1408_s26 = smov %s1188_s10 }
 0x31f   : > { %s1409_s27 = smov %s1177_s30  ;;  %19 = sbr.rel (!%p17_p3) target bundleno = 3 (0x3), region = 83 }
 0x326   :  { %803 = vsyncpa [#allocation3], 1 }
 0x327   :  { %805 = vsyncpa [#allocation3 + $0x1], 1 }

</bundles_post_ra>
